<compile_context>
chip_gen: v7x
topology: tpu7x:2x2x1
jax: 0.10.0
libtpu: 0.0.40
codegen_flags: <defaults>
</compile_context>

<pallas_src>
import jax
import jax.numpy as jnp
from jax.experimental import pallas as pl
from jax.experimental.pallas import tpu as pltpu


def _round_up(x, m):
    return (x + m - 1) // m * m


def _cdiv(a, b):
    return -(-a // b)


# ----------------------------------------------------------------------------
# Pallas kernel: fused LoRA forward on one (row-tile, out-tile) block.
#   x_ref      : [TM, IN_pad]       (activation dtype)
#   down_t_ref : [IN_pad, RANK_pad] (compute dtype, pre-transposed)
#   up_t_ref   : [RANK_pad, TN]     (compute dtype, pre-transposed, scale folded)
#   o_ref      : [TM, TN]           (activation dtype)
#   h_ref      : [TM, RANK_pad]     (compute dtype scratch, persists across j)
# ----------------------------------------------------------------------------
def _lilora_kernel(x_ref, down_t_ref, up_t_ref, o_ref, h_ref):
    # Down-projection once per row tile (j == 0); reused for every out tile.
    @pl.when(pl.program_id(1) == 0)
    def _():
        x = x_ref[...].astype(down_t_ref.dtype)          # no-op if dtypes match
        h_ref[...] = jnp.dot(
            x, down_t_ref[...],
            preferred_element_type=jnp.float32).astype(h_ref.dtype)

    # Up-projection for this out-feature tile, f32 accumulate on the MXU.
    o_ref[...] = jnp.dot(
        h_ref[...], up_t_ref[...],
        preferred_element_type=jnp.float32).astype(o_ref.dtype)


def lilora_forward(hidden_states, down, up, *, network_alpha=None, rank=None,
                   tile_m=512, tile_n=2048):
    """Pallas implementation of LiLoRALinearLayer.forward (2-D down/up path)."""
    if down.ndim != 2 or up.ndim != 2:
        # TODO(synk): 3-D per-batch einsum branch not implemented.
        raise NotImplementedError("only the 2-D F.linear down/up path is implemented")

    orig_dtype = hidden_states.dtype
    rank_dim, in_features = down.shape
    out_features, rank_dim2 = up.shape
    assert rank_dim == rank_dim2, "down/up rank mismatch"
    if rank is None:
        rank = rank_dim
    scale = (float(network_alpha) / rank) if network_alpha is not None else 1.0

    lead_shape = hidden_states.shape[:-1]
    x2d = hidden_states.reshape(-1, in_features)
    m = x2d.shape[0]
    if m == 0:
        return jnp.zeros((*lead_shape, out_features), orig_dtype)

    # bf16 weights + f32 accumulation keeps the MXU single-pass (HBM-bound).
    compute_dtype = jnp.bfloat16 if down.dtype == jnp.float32 else down.dtype

    # ---- lane-dense feature / rank padding (multiples of 128) --------------
    in_pad = _round_up(in_features, 128)
    out_pad = _round_up(out_features, 128)
    rank_pad = _round_up(rank_dim, 128)

    # Pre-transpose weights once; fold scale into up_t in f32, round once.
    down_t = jnp.pad(down.T.astype(compute_dtype),
                     ((0, in_pad - in_features), (0, rank_pad - rank_dim)))
    up_t = jnp.pad((up.astype(jnp.float32) * scale).T.astype(compute_dtype),
                   ((0, rank_pad - rank_dim), (0, out_pad - out_features)))

    # Pad the activation's feature dim only when needed; rows are never padded.
    x_in = x2d if in_pad == in_features else jnp.pad(
        x2d, ((0, 0), (0, in_pad - in_features)))

    # ---- generation-aware VMEM budget ---------------------------------------
    x_bytes = jnp.dtype(x_in.dtype).itemsize
    o_bytes = jnp.dtype(orig_dtype).itemsize
    w_bytes = jnp.dtype(compute_dtype).itemsize
    h_bytes = jnp.dtype(compute_dtype).itemsize

    try:
        vmem_cap = int(pltpu.get_tpu_info().vmem_capacity_bytes)
    except Exception:  # be conservative if the query is unavailable
        vmem_cap = 64 * 1024 * 1024
    if vmem_cap >= 96 * 1024 * 1024:          # v5e / v6e: 128 MiB per core
        vmem_budget = 88 * 1024 * 1024
        vmem_limit = 100 * 1024 * 1024
    else:                                      # v7x: 64 MiB per TensorCore
        vmem_budget = 40 * 1024 * 1024
        vmem_limit = 48 * 1024 * 1024

    # Out-feature tile (lane-dense, bounds VMEM independent of out_features).
    tn = min(out_pad, _round_up(int(tile_n), 128))
    grid_n = _cdiv(out_pad, tn)

    # tile_m budget: weights (double-buffered, constant index_map -> one DMA),
    # x / out blocks (double-buffered), h scratch, and the f32 dot results.
    fixed_bytes = 2 * (in_pad * rank_pad + rank_pad * tn) * w_bytes
    per_row = (2 * in_pad * x_bytes          # x block (double-buffered)
               + 2 * tn * o_bytes            # out block (double-buffered)
               + rank_pad * h_bytes          # h scratch (single)
               + rank_pad * 4                # f32 result of first dot
               + tn * 4)                     # f32 result of second dot
    tm_cap = max(16, int((vmem_budget - fixed_bytes) // per_row) // 16 * 16)

    m16 = _round_up(m, 16)
    tm = max(16, min(_round_up(int(tile_m), 16), tm_cap, m16))
    grid_m = _cdiv(m, tm)

    # Megacore (v7x): prefer an even number of row tiles (>= 4 when possible)
    # so each TensorCore gets equal work and >= 2 pipelined grid steps.
    max_tiles = m16 // 16
    target = grid_m + (grid_m % 2)
    target = max(target, min(4, max_tiles))
    target = min(target, max_tiles)
    if target % 2 == 1 and target > 1:
        target -= 1
    if target > grid_m:
        tm = max(16, min(tm, _round_up(_cdiv(m16, target), 16)))
        grid_m = _cdiv(m, tm)

    # Advisory cost from the shapes actually moved (mem-bound kernel).
    cost = pl.CostEstimate(
        flops=2 * grid_m * tm * rank_pad * (in_pad + out_pad),
        transcendentals=0,
        bytes_accessed=(grid_m * tm * in_pad * x_bytes
                        + grid_m * tm * out_pad * o_bytes
                        + (in_pad * rank_pad + rank_pad * out_pad) * w_bytes),
    )

    out2d_padded = pl.pallas_call(
        _lilora_kernel,
        out_shape=jax.ShapeDtypeStruct((m, out_pad), orig_dtype),
        grid_spec=pltpu.PrefetchScalarGridSpec(
            num_scalar_prefetch=0,
            grid=(grid_m, grid_n),
            in_specs=[
                # x: constant in j -> DMA elided across out-feature tiles.
                pl.BlockSpec((tm, in_pad), lambda i, j: (i, 0)),
                # Weights: constant index_map -> DMA'd once, VMEM-resident.
                pl.BlockSpec((in_pad, rank_pad), lambda i, j: (0, 0)),
                pl.BlockSpec((rank_pad, tn), lambda i, j: (0, j)),
            ],
            out_specs=pl.BlockSpec((tm, tn), lambda i, j: (i, j)),
            scratch_shapes=[pltpu.VMEM((tm, rank_pad), compute_dtype)],
        ),
        compiler_params=pltpu.CompilerParams(
            dimension_semantics=("parallel", "arbitrary"),
            vmem_limit_bytes=vmem_limit,
        ),
        cost_estimate=cost,
    )(x_in, down_t, up_t)

    out2d = (out2d_padded if out_pad == out_features
             else out2d_padded[:, :out_features])
    return out2d.reshape(*lead_shape, out_features)


# ----------------------------------------------------------------------------
# Parameter construction (glue, plain JAX) - mirrors update_weight() for the
# 1-D weight / 2-D down-up case.  (Exact torch.manual_seed-based orthogonal
# aux init is not reproducible; a JAX orthogonal initializer is used instead.)
# ----------------------------------------------------------------------------
def make_lilora_params(key, in_features, out_features, down_dim, up_dim, rank):
    k_w, k_da, k_ua = jax.random.split(key, 3)

    # self.weight : [down_dim*rank + up_dim*rank]
    weight = jax.random.normal(
        k_w, (down_dim * rank + up_dim * rank,), dtype=jnp.float32)

    ortho = jax.nn.initializers.orthogonal()
    down_aux = ortho(k_da, (down_dim, in_features), jnp.float32)   # [down_dim, in]
    up_aux = ortho(k_ua, (out_features, up_dim), jnp.float32)      # [out, up_dim]

    w_down = weight[: down_dim * rank].reshape(rank, down_dim)     # [rank, down_dim]
    w_up = weight[down_dim * rank:].reshape(up_dim, rank)          # [up_dim, rank]

    down = w_down @ down_aux          # [rank, in_features]
    up = up_aux @ w_up                # [out_features, rank]
    return down, up


if __name__ == "__main__":
    # Small, forward-consistent shapes (wrapper pads to lane-dense internally).
    batch, seq = 2, 8
    in_features, out_features = 32, 32
    down_dim, up_dim, rank = 16, 8, 2
    network_alpha = 4.0

    key = jax.random.PRNGKey(0)
    k_param, k_x = jax.random.split(key)

    down, up = make_lilora_params(
        k_param, in_features, out_features, down_dim, up_dim, rank)

    # hidden_states in a lower precision to exercise the dtype round-trip.
    hidden_states = jax.random.normal(
        k_x, (batch, seq, in_features), dtype=jnp.float32).astype(jnp.bfloat16)

    out = lilora_forward(hidden_states, down, up,
                         network_alpha=network_alpha, rank=rank)
    out = jax.block_until_ready(out)

    assert out.shape == (batch, seq, out_features)
    assert out.dtype == hidden_states.dtype

    scale = network_alpha / rank
    x_f32 = hidden_states.astype(jnp.float32)

    # (a) Loose semantic check against the full-f32 reference forward.
    ref_f32 = ((x_f32 @ down.T) @ up.T) * scale
    assert jnp.allclose(out.astype(jnp.float32), ref_f32,
                        atol=1e-1, rtol=1e-1)

    # (b) Tight check against a reference that mirrors the kernel's rounding
    #     points (bf16 weights with scale folded, bf16 down-projection,
    #     f32 accumulation, bf16 output) - matches the module's "compute in
    #     self.down.dtype" semantics with bf16 compute.
    dq = down.astype(jnp.bfloat16).astype(jnp.float32)
    uq = (up.astype(jnp.float32) * scale).astype(jnp.bfloat16).astype(jnp.float32)
    h_q = (x_f32 @ dq.T).astype(jnp.bfloat16).astype(jnp.float32)
    ref_q = (h_q @ uq.T).astype(hidden_states.dtype).astype(jnp.float32)
    assert jnp.allclose(out.astype(jnp.float32), ref_q,
                        atol=2e-2, rtol=2e-2)

    print("KERNEL_OK")
</pallas_src>

<mosaic_0001>
module attributes {stable_mosaic.version = 11 : i64} {
  func.func @_lilora_kernel(%arg0: i32, %arg1: i32, %arg2: memref<16x128xbf16, #tpu.memory_space<vmem>>, %arg3: memref<128x128xbf16, #tpu.memory_space<vmem>>, %arg4: memref<128x128xbf16, #tpu.memory_space<vmem>>, %arg5: memref<16x128xbf16, #tpu.memory_space<vmem>>, %arg6: memref<16x128xbf16, #tpu.memory_space<vmem>>) attributes {dimension_semantics = [#tpu.dimension_semantics<parallel>, #tpu.dimension_semantics<arbitrary>], iteration_bounds = array<i64: 1, 1>, scalar_prefetch = 0 : i64, scratch_operands = 1 : i64, tpu.core_type = #tpu.core_type<tc>, window_params = [{transform_indices = @transform_0, window_bounds = array<i64: 16, 128>}, {pipeline_mode = #tpu.pipeline_mode<synchronous>, transform_indices = @transform_1, window_bounds = array<i64: 128, 128>}, {transform_indices = @transform_2, window_bounds = array<i64: 128, 128>}, {transform_indices = @transform_3, window_bounds = array<i64: 16, 128>}]} {
    %c0_i32 = arith.constant 0 : i32
    %0 = arith.cmpi eq, %arg1, %c0_i32 : i32
    %1 = arith.extui %0 : i1 to i32
    %c0_i32_0 = arith.constant 0 : i32
    %2 = arith.cmpi ne, %1, %c0_i32_0 : i32
    scf.if %2 {
      %c0_6 = arith.constant 0 : index
      %c0_7 = arith.constant 0 : index
      %8 = vector.load %arg2[%c0_6, %c0_7] : memref<16x128xbf16, #tpu.memory_space<vmem>>, vector<16x128xbf16>
      %c0_8 = arith.constant 0 : index
      %c0_9 = arith.constant 0 : index
      %9 = vector.load %arg3[%c0_8, %c0_9] : memref<128x128xbf16, #tpu.memory_space<vmem>>, vector<128x128xbf16>
      %cst_10 = arith.constant dense<0.000000e+00> : vector<16x128xf32>
      %10 = tpu.matmul %8, %9, %cst_10 {dimension_numbers = #tpu.dot_dimension_numbers<[1], [0], [0], [1], [0, 0, 1, 1], [], []>} : vector<16x128xbf16>, vector<128x128xbf16>, vector<16x128xf32> -> vector<16x128xf32>
      %11 = arith.truncf %10 : vector<16x128xf32> to vector<16x128xbf16>
      %c0_11 = arith.constant 0 : index
      %c0_12 = arith.constant 0 : index
      %12 = vector.load %arg6[%c0_11, %c0_12] : memref<16x128xbf16, #tpu.memory_space<vmem>>, vector<16x128xbf16>
      tpu.vector_store %arg6[%c0_11, %c0_12], %11 {strides = array<i32>} : memref<16x128xbf16, #tpu.memory_space<vmem>>, vector<16x128xbf16>,
    } else {
    }
    %c0 = arith.constant 0 : index
    %c0_1 = arith.constant 0 : index
    %3 = vector.load %arg6[%c0, %c0_1] : memref<16x128xbf16, #tpu.memory_space<vmem>>, vector<16x128xbf16>
    %c0_2 = arith.constant 0 : index
    %c0_3 = arith.constant 0 : index
    %4 = vector.load %arg4[%c0_2, %c0_3] : memref<128x128xbf16, #tpu.memory_space<vmem>>, vector<128x128xbf16>
    %cst = arith.constant dense<0.000000e+00> : vector<16x128xf32>
    %5 = tpu.matmul %3, %4, %cst {dimension_numbers = #tpu.dot_dimension_numbers<[1], [0], [0], [1], [0, 0, 1, 1], [], []>} : vector<16x128xbf16>, vector<128x128xbf16>, vector<16x128xf32> -> vector<16x128xf32>
    %6 = arith.truncf %5 : vector<16x128xf32> to vector<16x128xbf16>
    %c0_4 = arith.constant 0 : index
    %c0_5 = arith.constant 0 : index
    %7 = vector.load %arg5[%c0_4, %c0_5] : memref<16x128xbf16, #tpu.memory_space<vmem>>, vector<16x128xbf16>
    tpu.vector_store %arg5[%c0_4, %c0_5], %6 {strides = array<i32>} : memref<16x128xbf16, #tpu.memory_space<vmem>>, vector<16x128xbf16>,
    return
  }
  func.func @transform_0(%arg0: i32, %arg1: i32) -> (i32, i32) {
    %c0_i32 = arith.constant 0 : i32
    %c0_i32_0 = arith.constant 0 : i32
    return %arg0, %c0_i32 : i32, i32
  }
  func.func @transform_1(%arg0: i32, %arg1: i32) -> (i32, i32) {
    %c0_i32 = arith.constant 0 : i32
    %c0_i32_0 = arith.constant 0 : i32
    %c0_i32_1 = arith.constant 0 : i32
    return %c0_i32, %c0_i32_0 : i32, i32
  }
  func.func @transform_2(%arg0: i32, %arg1: i32) -> (i32, i32) {
    %c0_i32 = arith.constant 0 : i32
    %c0_i32_0 = arith.constant 0 : i32
    return %c0_i32, %arg1 : i32, i32
  }
  func.func @transform_3(%arg0: i32, %arg1: i32) -> (i32, i32) {
    %c0_i32 = arith.constant 0 : i32
    return %arg0, %arg1 : i32, i32
  }
}

</mosaic_0001>

<bundles_post_ra>
// kernel: tpu_custom_call.1
= control target key start
LH: loop header
LB: loop body
LE: loop exit
PB: predicated region body
PF: predicated region fallthrough
CT: control target
= control target key end

     0   :  { %8 = vsyncpa [#allocation4], 0  ;;  %s608_s0 = inlined_call_operand.hbm [shape: bf16[16,128], index: 0, kind: input, shape index: {}]   ;;  %s609_s1 = inlined_call_operand.hbm [shape: bf16[128,128], index: 1, kind: input, shape index: {}]   ;;  %s610_s2 = inlined_call_operand.hbm [shape: bf16[128,128], index: 2, kind: input, shape index: {}]   ;;  %s611_s3 = inlined_call_operand.hbm [shape: bf16[16,128], index: 3, kind: output, shape index: {}]  }
   0x1   :  { %9 = vsyncpa [#allocation7], 0 }
   0x2   :  { %10 = vsyncpa [#allocation5], 0  ;;  %s513_s12 = smov [#allocation6]   ;;  %s514_s14 = smov [#allocation3]  }
   0x3   :  { %s28_s13 = sshll.u32 %s513_s12, 4  ;;  %s16_s15 = sshll.u32 %s514_s14, 4  ;;  %s29_s13 = int_to_ptr.vmem [resolvable:$true] %s28_s13  ;;  %s541_s15 = int_to_ptr.vmem [resolvable:$true] %s16_s15 }
   0x4   :  { %s419_s18 = scalar_lea.hbm %s609_s1, 1024 }
   0x5   :  { %p420_p0 = scmp.ne.s32.totalorder %s609_s1, %s419_s18  ;;  %p423_p1 = scmp.lt.u32.totalorder %s419_s18, %s609_s1 }
   0x7   :  { %p425_p2 = pnand %p423_p1, %p420_p0 }
   0x9   :  { %428 = shalt.err (!%p425_p2)
}
   0xa   :  { %s429_s23 = scalar_lea.vmem %s29_s13, 1024  ;;  %p434_p4 = scmp.lt.s32.totalorder %s29_s13, %s29_s13 }
   0xb   :  { %p430_p3 = scmp.ne.s32.totalorder %s29_s13, %s429_s23  ;;  %p435_p5 = scmp.lt.s32.totalorder %s429_s23, %s429_s23 }
   0xd   :  { %p436_p6 = por %p435_p5, %p434_p4 }
   0xf   :  { %p437_p7 = pnand %p436_p6, %p430_p3 }
  0x11   :  { %440 = shalt.err (!%p437_p7)
}
  0x12   :  { %s515_s24 = smov 64   ;;  %s516_s25 = smov 4  }
  0x13   :  { %34 = dma.hbm_to_vmem [thread:$0]  %s609_s1, 1024, %s29_s13, [#allocation7], %s515_s24, %s515_s24, %s516_s25  }
  0x14   :  { %s441_s30 = scalar_lea.hbm %s608_s0, 128 }
  0x15   :  { %p442_p8 = scmp.ne.s32.totalorder %s608_s0, %s441_s30  ;;  %p445_p9 = scmp.lt.u32.totalorder %s441_s30, %s608_s0 }
  0x17   :  { %p447_p10 = pnand %p445_p9, %p442_p8 }
  0x19   :  { %450 = shalt.err (!%p447_p10)
}
  0x1a   :  { %s451_s8 = scalar_lea.vmem %s541_s15, 128  ;;  %p456_p12 = scmp.lt.s32.totalorder %s541_s15, %s541_s15 }
  0x1b   :  { %p452_p11 = scmp.ne.s32.totalorder %s541_s15, %s451_s8  ;;  %p457_p13 = scmp.lt.s32.totalorder %s451_s8, %s451_s8 }
  0x1d   :  { %p458_p0 = por %p457_p13, %p456_p12 }
  0x1f   :  { %p459_p1 = pnand %p458_p0, %p452_p11 }
  0x21   :  { %462 = shalt.err (!%p459_p1)
}
  0x22   :  { %22 = dma.hbm_to_vmem [thread:$0]  %s608_s0, 128, %s541_s15, [#allocation4], %s515_s24, %s515_s24, %s516_s25  }
  0x23   :  { %s517_s10 = smov [#allocation8]   ;;  %s463_s14 = scalar_lea.hbm %s610_s2, 1024 }
  0x24   :  { %s40_s11 = sshll.u32 %s517_s10, 4  ;;  %p464_p2 = scmp.ne.s32.totalorder %s610_s2, %s463_s14  ;;  %s41_s11 = int_to_ptr.vmem [resolvable:$true] %s40_s11 }
  0x25   :  { %p467_p3 = scmp.lt.u32.totalorder %s463_s14, %s610_s2 }
  0x27   :  { %p469_p4 = pnand %p467_p3, %p464_p2 }
  0x29   :  { %472 = shalt.err (!%p469_p4)
}
  0x2a   :  { %s473_s20 = scalar_lea.vmem %s41_s11, 1024  ;;  %p478_p6 = scmp.lt.s32.totalorder %s41_s11, %s41_s11 }
  0x2b   :  { %p474_p5 = scmp.ne.s32.totalorder %s41_s11, %s473_s20  ;;  %p479_p7 = scmp.lt.s32.totalorder %s473_s20, %s473_s20 }
  0x2d   :  { %p480_p8 = por %p479_p7, %p478_p6 }
  0x2f   :  { %p481_p9 = pnand %p480_p8, %p474_p5 }
  0x31   :  { %484 = shalt.err (!%p481_p9)
}
  0x32   :  { %46 = dma.hbm_to_vmem [thread:$0]  %s610_s2, 1024, %s41_s11, [#allocation7], %s515_s24, %s515_s24, %s516_s25  }
  0x33   :  { %507 = dma.done.wait [#allocation4], 128  }
  0x34   :  { %508 = vsyncadd [#allocation4], 4294967168 }
  0x35   :  { %509 = dma.done.wait [#allocation7], 2048  }
  0x36   :  { %510 = vsyncadd [#allocation7], 4294965248  ;;  %v518_v0 = vmov 0.0   ;;  %vm519_vm0 = vmmov 0   ;;  %v402_v1 = vld [vmem:[#allocation6] sm:$0xff]   ;;  %v403_v2 = vld [vmem:[#allocation6 + $0x8] sm:$0xff]  }
  0x37   :  { %354 = vmatprep.subr.bf16.mxu0 %v518_v0  ;;  %370 = vmatprep.mubr.msk.bf16.mxu0 %vm519_vm0, %v518_v0  ;;  %v404_v3 = vld [vmem:[#allocation6 + $0x10] sm:$0xff]   ;;  %v411_v4 = vld [vmem:[#allocation8] sm:$0xff]   ;;  %v405_v5 = vld [vmem:[#allocation6 + $0x18] sm:$0xff]   ;;  %s520_s2 = smov [#allocation9]  }
  0x38   :  { %374 = vmatprep.subr.bf16.mxu1 %v518_v0  ;;  %390 = vmatprep.mubr.msk.bf16.mxu1 %vm519_vm0, %v518_v0  ;;  %v412_v6 = vld [vmem:[#allocation8 + $0x8] sm:$0xff]   ;;  %v406_v7 = vld [vmem:[#allocation6 + $0x20] sm:$0xff]   ;;  %v413_v8 = vld [vmem:[#allocation8 + $0x10] sm:$0xff]   ;;  %s297_s21 = sshll.u32 %s520_s2, 4  ;;  %s298_s21 = int_to_ptr.vmem [resolvable:$true] %s297_s21 }
  0x39   :  { %355 = vmatpush3.bf16.msra.mxu0 %v402_v1  ;;  %375 = vmatpush3.bf16.msra.mxu1 %v411_v4  ;;  %v407_v9 = vld [vmem:[#allocation6 + $0x28] sm:$0xff]   ;;  %v414_v10 = vld [vmem:[#allocation8 + $0x18] sm:$0xff]   ;;  %v408_v11 = vld [vmem:[#allocation6 + $0x30] sm:$0xff]   ;;  %s485_s22 = scalar_lea.vmem %s298_s21, 128  ;;  %p490_p11 = scmp.lt.s32.totalorder %s298_s21, %s298_s21 }
  0x3a   :  { %356 = vmatprep.subr.bf16.mxu0 %v518_v0  ;;  %376 = vmatprep.subr.bf16.mxu1 %v518_v0  ;;  %v415_v12 = vld [vmem:[#allocation8 + $0x20] sm:$0xff]   ;;  %v409_v13 = vld [vmem:[#allocation6 + $0x38] sm:$0xff]   ;;  %v416_v14 = vld [vmem:[#allocation8 + $0x28] sm:$0xff]   ;;  %p486_p10 = scmp.ne.s32.totalorder %s298_s21, %s485_s22  ;;  %p491_p12 = scmp.lt.s32.totalorder %s485_s22, %s485_s22 }
  0x3b   :  { %v410_v15 = vld [vmem:[#allocation3] sm:$0xff]   ;;  %v417_v16 = vld [vmem:[#allocation8 + $0x30] sm:$0xff]  }
  0x3c   :  { %v418_v17 = vld [vmem:[#allocation8 + $0x38] sm:$0xff]   ;;  %p492_p13 = por %p491_p12, %p490_p11 }
  0x3d   :  { %357 = vmatpush3.bf16.msra.mxu0 %v403_v2  ;;  %377 = vmatpush3.bf16.msra.mxu1 %v412_v6 }
  0x3e   :  { %358 = vmatprep.subr.bf16.mxu0 %v518_v0  ;;  %378 = vmatprep.subr.bf16.mxu1 %v518_v0  ;;  %p493_p0 = pnand %p492_p13, %p486_p10 }
  0x41   :  { %359 = vmatpush3.bf16.msra.mxu0 %v404_v3  ;;  %379 = vmatpush3.bf16.msra.mxu1 %v413_v8 }
  0x42   :  { %360 = vmatprep.subr.bf16.mxu0 %v518_v0  ;;  %380 = vmatprep.subr.bf16.mxu1 %v518_v0 }
  0x45   :  { %361 = vmatpush3.bf16.msra.mxu0 %v405_v5  ;;  %381 = vmatpush3.bf16.msra.mxu1 %v414_v10 }
  0x46   :  { %362 = vmatprep.subr.bf16.mxu0 %v518_v0  ;;  %382 = vmatprep.subr.bf16.mxu1 %v518_v0 }
  0x49   :  { %363 = vmatpush3.bf16.msra.mxu0 %v406_v7  ;;  %383 = vmatpush3.bf16.msra.mxu1 %v415_v12 }
  0x4a   :  { %364 = vmatprep.subr.bf16.mxu0 %v518_v0  ;;  %384 = vmatprep.subr.bf16.mxu1 %v518_v0 }
  0x4d   :  { %365 = vmatpush3.bf16.msra.mxu0 %v407_v9  ;;  %385 = vmatpush3.bf16.msra.mxu1 %v416_v14 }
  0x4e   :  { %366 = vmatprep.subr.bf16.mxu0 %v518_v0  ;;  %386 = vmatprep.subr.bf16.mxu1 %v518_v0 }
  0x51   :  { %367 = vmatpush3.bf16.msra.mxu0 %v408_v11  ;;  %387 = vmatpush3.bf16.msra.mxu1 %v417_v16 }
  0x52   :  { %368 = vmatprep.subr.bf16.mxu0 %v518_v0  ;;  %388 = vmatprep.subr.bf16.mxu1 %v518_v0 }
  0x55   :  { %369 = vmatpush3.bf16.msra.mxu0 %v409_v13  ;;  %389 = vmatpush3.bf16.msra.mxu1 %v418_v17 }
  0x58   :  { %371 = vmatmul.mubr.bf16.vlgmr.msra.gmra.mrb[0].mxu0 %v410_v15 }
 0x12b   :  { %v167_v18 = vpop.f32.mrb[0].mxu0 }
 0x12c   :  { %v372_v19 = vpop.f32.mrb[1].mxu0 }
 0x12d   :  { %v170_v20 = vpop.f32.mrb[2].mxu0 }
 0x12e   :  { %v174_v21 = vpack.c.bf16 %v170_v20, %v167_v18  ;;  %v373_v22 = vpop.f32.mrb[3].mxu0 }
 0x130   :  { %391 = vmatmul.mubr.bf16.vlgmr.msra.gmra.mrb[0].mxu1 %v174_v21 }
 0x203   :  { %v275_v23 = vpop.f32.mrb[0].mxu1 }
 0x204   :  { %v392_v24 = vpop.f32.mrb[1].mxu1 }
 0x205   :  { %v278_v25 = vpop.f32.mrb[2].mxu1 }
 0x206   :  { %v334_v26 = vpack.c.bf16 %v278_v25, %v275_v23  ;;  %v393_v27 = vpop.f32.mrb[3].mxu1 }
 0x208   :  { %335 = vst [vmem:[#allocation9] sm:$0xff] %v334_v26  }
 0x209   :  { %496 = shalt.err (!%p493_p0)
}
 0x20a   :  { %s497_s27 = scalar_lea.hbm %s611_s3, 128 }
 0x20b   :  { %p498_p1 = scmp.ne.s32.totalorder %s611_s3, %s497_s27  ;;  %p501_p2 = scmp.lt.u32.totalorder %s497_s27, %s611_s3 }
 0x20d   :  { %p503_p3 = pnand %p501_p2, %p498_p1 }
 0x20f   :  { %506 = shalt.err (!%p503_p3)
}
 0x210   :  { %303 = dma.vmem_to_hbm [thread:$0]  %s298_s21, 128, %s611_s3, [#allocation5], %s515_s24, %s515_s24, %s516_s25  }
 0x211   :  { %511 = dma.done.wait [#allocation5], 128  }
 0x212   :  { %512 = vsyncadd [#allocation5], 4294967168 }
 0x213   :  { %307 = vsyncpa [#allocation4], 1 }
 0x214   :  { %308 = vsyncpa [#allocation7], 1 }
 0x215   :  { %309 = vsyncpa [#allocation5], 1 }

</bundles_post_ra>
